<compile_context>
chip_gen: v7x
topology: tpu7x:2x2x1
jax: 0.10.0
libtpu: 0.0.40
codegen_flags: <defaults>
</compile_context>

<pallas_src>
import functools

import jax
import jax.numpy as jnp
from jax.experimental import pallas as pl
from jax.experimental.pallas import tpu as pltpu


# ---------------------------------------------------------------------------
# Kernels
# ---------------------------------------------------------------------------
def _linear_kernel_bias(x_ref, w_ref, b_ref, o_ref, acc_ref):
    # x_ref:  (tm, tk)  compute-dtype activation tile
    # w_ref:  (tk, tn)  compute-dtype weight tile in [IN, OUT] layout
    #                   (K on sublanes, OUT on lanes: the layout the MXU wants)
    # b_ref:  (1,  tn)  bias tile
    # o_ref:  (tm, tn)  output tile (resident across the K grid axis)
    # acc_ref:(tm, tn)  float32 accumulator scratch
    k = pl.program_id(2)

    @pl.when(k == 0)
    def _():
        # Fold bias into the accumulator init -> epilogue is just cast+store.
        acc_ref[...] = jnp.broadcast_to(
            b_ref[...].astype(jnp.float32), acc_ref.shape
        )

    acc_ref[...] += jnp.dot(
        x_ref[...], w_ref[...], preferred_element_type=jnp.float32
    )

    @pl.when(k == pl.num_programs(2) - 1)
    def _():
        o_ref[...] = acc_ref[...].astype(o_ref.dtype)


def _linear_kernel_nobias(x_ref, w_ref, o_ref, acc_ref):
    k = pl.program_id(2)

    @pl.when(k == 0)
    def _():
        acc_ref[...] = jnp.zeros_like(acc_ref)

    acc_ref[...] += jnp.dot(
        x_ref[...], w_ref[...], preferred_element_type=jnp.float32
    )

    @pl.when(k == pl.num_programs(2) - 1)
    def _():
        o_ref[...] = acc_ref[...].astype(o_ref.dtype)


# ---------------------------------------------------------------------------
# Tile selection helpers
# ---------------------------------------------------------------------------
def _round_up(a, m):
    return ((a + m - 1) // m) * m


def _pick_tile(dim, candidates):
    """Largest candidate that evenly divides `dim`; else the full extent
    (always a legal block shape, and only used for small/awkward M or OUT)."""
    for t in candidates:
        if t <= dim and dim % t == 0:
            return t
    return dim


def _choose_k_tiling(K, tk):
    """Return (K_pad, tk). Never produces a non-dividing K tile."""
    if tk is not None:
        tk = int(tk)
        return _round_up(K, tk), tk
    # Prefer 256-multiples (v6e/v7x MXU is 2x256x256), fall back to 128.
    for t in (1024, 512, 256, 128):
        if K % t == 0:
            return K, t
    if K < 128:
        return K, K                    # tiny K: full-extent block is cheap & legal
    K_pad = _round_up(K, 128)          # zero-pad K instead of a tk=K blow-up
    for t in (1024, 512, 256, 128):
        if K_pad % t == 0:
            return K_pad, t
    return K_pad, 128                  # unreachable (128 | K_pad)


# ---------------------------------------------------------------------------
# Wrapper
# ---------------------------------------------------------------------------
@functools.partial(jax.jit, static_argnames=("tm", "tn", "tk", "compute_dtype"))
def linear_pallas(x, weight, bias=None, *, tm=None, tn=None, tk=None,
                  compute_dtype=None):
    """
    x:      [M, IN_DIM]
    weight: [OUT_DIM, IN_DIM]   (PyTorch convention)
    bias:   [OUT_DIM] or None
    returns [M, OUT_DIM] in x.dtype

    compute_dtype: dtype fed to the MXU (accumulation is always f32).
      Defaults to bf16 for f32/bf16 inputs (peak-MXU path); pass jnp.float32
      for a bit-faithful f32 matmul.
    """
    M, K = x.shape
    OUT, K2 = weight.shape
    assert K == K2, "in_features mismatch"

    out_dtype = x.dtype
    if compute_dtype is None:
        cdt = jnp.bfloat16 if x.dtype in (jnp.float32, jnp.bfloat16) else x.dtype
    else:
        cdt = compute_dtype
    cbytes = jnp.dtype(cdt).itemsize
    obytes = jnp.dtype(out_dtype).itemsize

    # ---- tile selection --------------------------------------------------
    min_tm = 16 if cbytes < 4 else 8          # bf16 packs (16,128) per vreg
    tm_cands = tuple(t for t in (512, 256, 128, 64, 32, 16, 8) if t >= min_tm)
    if tm is None:
        tm = _pick_tile(M, tm_cands)
    elif M % tm != 0:
        raise ValueError(f"tm={tm} must divide M={M}")
    if tn is None:
        tn = _pick_tile(OUT, (512, 256, 128))
    elif OUT % tn != 0:
        raise ValueError(f"tn={tn} must divide OUT={OUT}")

    # v7x megacore: make sure the parallel grid has at least 2 blocks.
    if (pl.cdiv(M, tm) * pl.cdiv(OUT, tn)) < 2:
        if tm >= 2 * min_tm and tm % 2 == 0 and M % (tm // 2) == 0:
            tm //= 2
        elif tn >= 256 and OUT % (tn // 2) == 0:
            tn //= 2

    K_pad, tk = _choose_k_tiling(K, tk)

    # ---- operand prep ------------------------------------------------------
    # Weight -> [K, N] (one amortized transpose; weights are static in
    # inference), cast to compute dtype, zero-pad K so every K step is exact.
    x_c = x.astype(cdt)
    w_t = weight.swapaxes(0, 1).astype(cdt)   # [IN, OUT]
    if K_pad != K:
        x_c = jnp.pad(x_c, ((0, 0), (0, K_pad - K)))
        w_t = jnp.pad(w_t, ((0, K_pad - K), (0, 0)))

    gm, gn, gk = M // tm, OUT // tn, K_pad // tk
    grid = (gm, gn, gk)

    x_spec = pl.BlockSpec((tm, tk), lambda i, j, k: (i, k))
    w_spec = pl.BlockSpec((tk, tn), lambda i, j, k: (k, j))   # [K, N] layout
    o_spec = pl.BlockSpec((tm, tn), lambda i, j, k: (i, j))   # resident over K

    # Double-buffered working set -> explicit scoped-VMEM budget.
    ws = (2 * tm * tk * cbytes + 2 * tk * tn * cbytes
          + 2 * tm * tn * obytes + tm * tn * 4)
    if bias is not None:
        ws += 2 * tn * jnp.dtype(bias.dtype).itemsize
    vmem_limit = int(max(32 * 2**20, min(96 * 2**20, 2 * ws + (4 << 20))))

    compiler_params = pltpu.CompilerParams(
        dimension_semantics=("parallel", "parallel", "arbitrary"),
        vmem_limit_bytes=vmem_limit,
    )

    cost = pl.CostEstimate(
        flops=2 * M * OUT * K_pad,
        transcendentals=0,
        bytes_accessed=int(
            gn * M * K_pad * cbytes            # x re-streamed per N block
            + gm * OUT * K_pad * cbytes        # w re-streamed per M block
            + M * OUT * obytes
            + (OUT * jnp.dtype(bias.dtype).itemsize if bias is not None else 0)
        ),
    )

    scratch = [pltpu.VMEM((tm, tn), jnp.float32)]

    if bias is None:
        return pl.pallas_call(
            _linear_kernel_nobias,
            out_shape=jax.ShapeDtypeStruct((M, OUT), out_dtype),
            grid_spec=pltpu.PrefetchScalarGridSpec(
                num_scalar_prefetch=0,
                grid=grid,
                in_specs=[x_spec, w_spec],
                out_specs=o_spec,
                scratch_shapes=scratch,
            ),
            compiler_params=compiler_params,
            cost_estimate=cost,
        )(x_c, w_t)

    b2 = bias.reshape(1, OUT)
    b_spec = pl.BlockSpec((1, tn), lambda i, j, k: (0, j))
    return pl.pallas_call(
        _linear_kernel_bias,
        out_shape=jax.ShapeDtypeStruct((M, OUT), out_dtype),
        grid_spec=pltpu.PrefetchScalarGridSpec(
            num_scalar_prefetch=0,
            grid=grid,
            in_specs=[x_spec, w_spec, b_spec],
            out_specs=o_spec,
            scratch_shapes=scratch,
        ),
        compiler_params=compiler_params,
        cost_estimate=cost,
    )(x_c, w_t, b2)


# ---------------------------------------------------------------------------
# Self-test
# ---------------------------------------------------------------------------
if __name__ == "__main__":
    # Deterministic synthetic params (module: weight ~ randn, bias = zeros).
    in_features, out_features = 32, 64
    batch = 8

    key = jax.random.PRNGKey(0)
    kx, kw = jax.random.split(key)

    x = jax.random.normal(kx, (batch, in_features), dtype=jnp.float32)
    weight = jax.random.normal(kw, (out_features, in_features), dtype=jnp.float32)
    bias = jnp.zeros((out_features,), dtype=jnp.float32)

    ref = x @ weight.T + bias[None, :]

    # Default path (bf16 MXU, f32 accumulation) with bias.
    out = jax.block_until_ready(linear_pallas(x, weight, bias))
    assert out.shape == (batch, out_features)
    assert out.dtype == x.dtype
    assert jnp.allclose(out, ref, atol=5e-2, rtol=5e-2)

    # Bit-faithful f32 matmul path.
    out_f32 = jax.block_until_ready(
        linear_pallas(x, weight, bias, compute_dtype=jnp.float32))
    assert jnp.allclose(out_f32, ref, atol=1e-5, rtol=1e-5)

    # No-bias variant (Linear(bias=False)).
    out_nb = jax.block_until_ready(linear_pallas(x, weight, None))
    assert jnp.allclose(out_nb, x @ weight.T, atol=5e-2, rtol=5e-2)

    # Larger shape exercising K zero-padding (K=200 -> 256) + accumulator path.
    kx2, kw2 = jax.random.split(jax.random.PRNGKey(1))
    xb = jax.random.normal(kx2, (256, 200), dtype=jnp.float32)
    wb = jax.random.normal(kw2, (384, 200), dtype=jnp.float32)
    bb = jax.random.normal(jax.random.PRNGKey(2), (384,), dtype=jnp.float32)
    ref_big = xb @ wb.T + bb[None, :]

    out_big = jax.block_until_ready(linear_pallas(xb, wb, bb))          # bf16 MXU
    assert jnp.allclose(out_big, ref_big, atol=5e-1, rtol=5e-2)

    out_big_f32 = jax.block_until_ready(
        linear_pallas(xb, wb, bb, compute_dtype=jnp.float32))           # exact
    assert jnp.allclose(out_big_f32, ref_big, atol=1e-3, rtol=1e-3)

    # Explicit user tiles on a clean multiple-of-128 shape (K-tiled grid > 1).
    kx3, kw3 = jax.random.split(jax.random.PRNGKey(3))
    xc = jax.random.normal(kx3, (256, 512), dtype=jnp.float32)
    wc = jax.random.normal(kw3, (256, 512), dtype=jnp.float32)
    out_c = jax.block_until_ready(
        linear_pallas(xc, wc, None, tm=128, tn=128, tk=256,
                      compute_dtype=jnp.float32))
    assert jnp.allclose(out_c, xc @ wc.T, atol=1e-3, rtol=1e-3)

    print("KERNEL_OK")
</pallas_src>

<mosaic_0001>
module attributes {stable_mosaic.version = 11 : i64} {
  func.func @_linear_kernel_bias(%arg0: i32, %arg1: i32, %arg2: i32, %arg3: memref<8x32xbf16, #tpu.memory_space<vmem>>, %arg4: memref<32x64xbf16, #tpu.memory_space<vmem>>, %arg5: memref<1x64xf32, #tpu.memory_space<vmem>>, %arg6: memref<8x64xf32, #tpu.memory_space<vmem>>, %arg7: memref<8x64xf32, #tpu.memory_space<vmem>>) attributes {dimension_semantics = [#tpu.dimension_semantics<parallel>, #tpu.dimension_semantics<parallel>, #tpu.dimension_semantics<arbitrary>], iteration_bounds = array<i64: 1, 1, 1>, scalar_prefetch = 0 : i64, scratch_operands = 1 : i64, tpu.core_type = #tpu.core_type<tc>, window_params = [{transform_indices = @transform_0, window_bounds = array<i64: 8, 32>}, {transform_indices = @transform_1, window_bounds = array<i64: 32, 64>}, {transform_indices = @transform_2, window_bounds = array<i64: 1, 64>}, {transform_indices = @transform_3, window_bounds = array<i64: 8, 64>}]} {
    %c0_i32 = arith.constant 0 : i32
    %0 = arith.cmpi eq, %arg2, %c0_i32 : i32
    %1 = arith.extui %0 : i1 to i32
    %c0_i32_0 = arith.constant 0 : i32
    %2 = arith.cmpi ne, %1, %c0_i32_0 : i32
    scf.if %2 {
      %c0_10 = arith.constant 0 : index
      %c0_11 = arith.constant 0 : index
      %12 = vector.load %arg5[%c0_10, %c0_11] : memref<1x64xf32, #tpu.memory_space<vmem>>, vector<1x64xf32>
      %13 = vector.shape_cast %12 : vector<1x64xf32> to vector<1x64xf32>
      %14 = vector.broadcast %13 : vector<1x64xf32> to vector<8x64xf32>
      %c0_12 = arith.constant 0 : index
      %c0_13 = arith.constant 0 : index
      %15 = vector.load %arg7[%c0_12, %c0_13] : memref<8x64xf32, #tpu.memory_space<vmem>>, vector<8x64xf32>
      tpu.vector_store %arg7[%c0_12, %c0_13], %14 {strides = array<i32>} : memref<8x64xf32, #tpu.memory_space<vmem>>, vector<8x64xf32>,
    } else {
    }
    %c0 = arith.constant 0 : index
    %c0_1 = arith.constant 0 : index
    %3 = vector.load %arg7[%c0, %c0_1] : memref<8x64xf32, #tpu.memory_space<vmem>>, vector<8x64xf32>
    %c0_2 = arith.constant 0 : index
    %c0_3 = arith.constant 0 : index
    %4 = vector.load %arg3[%c0_2, %c0_3] : memref<8x32xbf16, #tpu.memory_space<vmem>>, vector<8x32xbf16>
    %c0_4 = arith.constant 0 : index
    %c0_5 = arith.constant 0 : index
    %5 = vector.load %arg4[%c0_4, %c0_5] : memref<32x64xbf16, #tpu.memory_space<vmem>>, vector<32x64xbf16>
    %cst = arith.constant dense<0.000000e+00> : vector<8x64xf32>
    %6 = tpu.matmul %4, %5, %cst {dimension_numbers = #tpu.dot_dimension_numbers<[1], [0], [0], [1], [0, 0, 1, 1], [], []>} : vector<8x32xbf16>, vector<32x64xbf16>, vector<8x64xf32> -> vector<8x64xf32>
    %7 = arith.addf %3, %6 : vector<8x64xf32>
    %c0_6 = arith.constant 0 : index
    %c0_7 = arith.constant 0 : index
    %8 = vector.load %arg7[%c0_6, %c0_7] : memref<8x64xf32, #tpu.memory_space<vmem>>, vector<8x64xf32>
    tpu.vector_store %arg7[%c0_6, %c0_7], %7 {strides = array<i32>} : memref<8x64xf32, #tpu.memory_space<vmem>>, vector<8x64xf32>,
    %c0_i32_8 = arith.constant 0 : i32
    %9 = arith.cmpi eq, %arg2, %c0_i32_8 : i32
    %10 = arith.extui %9 : i1 to i32
    %c0_i32_9 = arith.constant 0 : i32
    %11 = arith.cmpi ne, %10, %c0_i32_9 : i32
    scf.if %11 {
      %c0_10 = arith.constant 0 : index
      %c0_11 = arith.constant 0 : index
      %12 = vector.load %arg7[%c0_10, %c0_11] : memref<8x64xf32, #tpu.memory_space<vmem>>, vector<8x64xf32>
      %c0_12 = arith.constant 0 : index
      %c0_13 = arith.constant 0 : index
      %13 = vector.load %arg6[%c0_12, %c0_13] : memref<8x64xf32, #tpu.memory_space<vmem>>, vector<8x64xf32>
      tpu.vector_store %arg6[%c0_12, %c0_13], %12 {strides = array<i32>} : memref<8x64xf32, #tpu.memory_space<vmem>>, vector<8x64xf32>,
    } else {
    }
    return
  }
  func.func @transform_0(%arg0: i32, %arg1: i32, %arg2: i32) -> (i32, i32) {
    %c0_i32 = arith.constant 0 : i32
    return %arg0, %arg2 : i32, i32
  }
  func.func @transform_1(%arg0: i32, %arg1: i32, %arg2: i32) -> (i32, i32) {
    %c0_i32 = arith.constant 0 : i32
    return %arg2, %arg1 : i32, i32
  }
  func.func @transform_2(%arg0: i32, %arg1: i32, %arg2: i32) -> (i32, i32) {
    %c0_i32 = arith.constant 0 : i32
    %c0_i32_0 = arith.constant 0 : i32
    return %c0_i32, %arg1 : i32, i32
  }
  func.func @transform_3(%arg0: i32, %arg1: i32, %arg2: i32) -> (i32, i32) {
    %c0_i32 = arith.constant 0 : i32
    return %arg0, %arg1 : i32, i32
  }
}

</mosaic_0001>

<bundles_post_ra>
// kernel: linear_pallas.1
= control target key start
LH: loop header
LB: loop body
LE: loop exit
PB: predicated region body
PF: predicated region fallthrough
CT: control target
= control target key end

     0   :  { %v157_v1 = vmov 0.0   ;;  %vm158_vm0 = vmmov 0   ;;  %vm27_vm1 = vcmask 523264   ;;  %s207_s0 = inlined_call_operand.vmem [shape: bf16[8,32], index: 0, kind: input, shape index: {}]   ;;  %s208_s1 = inlined_call_operand.vmem [shape: bf16[32,64], index: 1, kind: input, shape index: {}]   ;;  %s209_s2 = inlined_call_operand.vmem [shape: f32[1,64], index: 2, kind: input, shape index: {}]   ;;  %s210_s3 = inlined_call_operand.hbm [shape: f32[8,64], index: 3, kind: output, shape index: {}]  }
   0x1   :  { %v131_v0 = vld [vmem:[%s208_s1] sm:$0xff]   ;;  %120 = vmatprep.subr.bf16.mxu0 %v157_v1  ;;  %v132_v2 = vld [vmem:[%s208_s1 + $0x8] sm:$0xff]   ;;  %124 = vmatprep.mubr.msk.bf16.mxu0 %vm158_vm0, %v157_v1 }
   0x2   :  { %121 = vmatpush3.bf16.msra.mxu0 %v131_v0  ;;  %v113_v3 = vld [vmem:[%s209_s2] ss:$0 sm:$0xff] }
   0x3   :  { %122 = vmatprep.subr.bf16.mxu0 %v157_v1  ;;  %28 = vst.msk [vmem:[#allocation2] sm:$0xff] %vm27_vm1, %v113_v3 }
   0x4   :  { %8 = vsyncpa [#allocation4], 0  ;;  %v30_v4 = vld [vmem:[%s207_s0] sm:$0xf]  ;;  %vm47_vm2 = vcmask 261120   ;;  %s159_s1 = smov [#allocation3]  }
   0x5   :  { %s105_s2 = sshll.u32 %s159_s1, 4  ;;  %s106_s2 = int_to_ptr.vmem [resolvable:$true] %s105_s2 }
   0x6   :  { %123 = vmatpush3.bf16.msra.mxu0 %v132_v2  ;;  %s133_s20 = scalar_lea.vmem %s106_s2, 128  ;;  %p138_p1 = scmp.lt.s32.totalorder %s106_s2, %s106_s2 }
   0x7   :  { %p134_p0 = scmp.ne.s32.totalorder %s106_s2, %s133_s20  ;;  %p139_p2 = scmp.lt.s32.totalorder %s133_s20, %s133_s20 }
   0x9   :  { %125 = vmatmul.mubr.msk.bf16.vlgmr.msra.gmra.mrb[0].mxu0 %vm47_vm2, %v30_v4  ;;  %p140_p3 = por %p139_p2, %p138_p1 }
   0xa   :  { %v29_v5 = vld [vmem:[#allocation2] sm:$0xff] }
   0xb   :  { %p141_p4 = pnand %p140_p3, %p134_p0 }
  0xdc   :  { %v85_v6 = vpop.f32.mrb[0].mxu0 }
  0xdd   :  { %v91_v7 = vadd.f32 %v85_v6, %v29_v5  ;;  %v126_v8 = vpop.f32.mrb[1].mxu0 }
  0xde   :  { %v88_v9 = vpop.f32.mrb[2].mxu0 }
  0xdf   :  { %93 = vst.msk [vmem:[#allocation2] sm:$0xff] %vm27_vm1, %v91_v7  ;;  %v127_v10 = vpop.f32.mrb[3].mxu0 }
  0xe6   :  { %v97_v11 = vld [vmem:[#allocation2] sm:$0xff] }
  0xe7   :  { %98 = vst.msk [vmem:[#allocation3] sm:$0xff] %vm27_vm1, %v97_v11 }
  0xe8   :  { %144 = shalt.err (!%p141_p4)
}
  0xe9   :  { %s145_s22 = scalar_lea.hbm %s210_s3, 128 }
  0xea   :  { %p146_p5 = scmp.ne.s32.totalorder %s210_s3, %s145_s22  ;;  %p149_p6 = scmp.lt.u32.totalorder %s145_s22, %s210_s3 }
  0xec   :  { %p151_p7 = pnand %p149_p6, %p146_p5 }
  0xee   :  { %154 = shalt.err (!%p151_p7)
}
  0xef   :  { %108 = dma.vmem_to_hbm [thread:$0]  %s106_s2, 128, %s210_s3, [#allocation4]  }
  0xf0   :  { %155 = dma.done.wait [#allocation4], 128  }
  0xf1   :  { %156 = vsyncadd [#allocation4], 4294967168 }
  0xf2   :  { %112 = vsyncpa [#allocation4], 1 }

</bundles_post_ra>
